<compile_context>
chip_gen: v7x
topology: tpu7x:2x2x1
jax: 0.10.0
libtpu: 0.0.40
codegen_flags: <defaults>
</compile_context>

<pallas_src>
import functools

import jax
import jax.numpy as jnp
from jax.experimental import pallas as pl
from jax.experimental.pallas import tpu as pltpu

LANE = 128     # TPU lane width (last dim)
SUBLANE = 8    # TPU sublane width (second-to-last dim)


def _round_up(x, m):
    return ((x + m - 1) // m) * m


def _pad2d(a, rows, cols):
    r, c = a.shape
    if r == rows and c == cols:
        return a
    return jnp.pad(a, ((0, rows - r), (0, cols - c)))


def _tpu_vmem_limit_bytes():
    """~82% of physical VMEM (105 MiB on v5e/v6e, 52 MiB on v7x)."""
    try:
        cap = pltpu.get_tpu_info().vmem_capacity_bytes
        return int(cap * 0.82)
    except Exception:
        return 64 * 1024 * 1024


def _default_tile_m():
    """Row-tile size per generation: v6e MXU is 2x256^2 -> 512-row tiles;
    v5e (4x128^2) and v7x (64 MiB VMEM) -> 256."""
    try:
        kind = jax.devices()[0].device_kind.lower()
    except Exception:
        kind = ""
    if "v6" in kind:
        return 512
    return 256


# -----------------------------------------------------------------------------
# Fused whole-graph-resident kernel: layer 1 + layer 2 + masked log_softmax.
# Best when adj fits scoped VMEM (adj is DMA'd once and used by both layers).
# -----------------------------------------------------------------------------
def _gcn_fused_kernel(x_ref, adj_ref, w1_ref, b1_ref, w2_ref, b2_ref, o_ref, *,
                      n_class, with_relu, with_bias):
    f32 = jnp.float32
    bf16 = jnp.bfloat16

    # ---- layer 1: h = [relu]( A @ (x @ W1) [+ b1] ) ---------------------
    xw = jnp.dot(x_ref[...], w1_ref[...], preferred_element_type=f32)
    h = jnp.dot(adj_ref[...], xw.astype(bf16), preferred_element_type=f32)
    if with_bias:
        h = h + b1_ref[...]
    if with_relu:
        h = jnp.maximum(h, 0.0)

    # ---- layer 2: z = A @ (h @ W2) [+ b2] --------------------------------
    hw = jnp.dot(h.astype(bf16), w2_ref[...], preferred_element_type=f32)
    z = jnp.dot(adj_ref[...], hw.astype(bf16), preferred_element_type=f32)
    if with_bias:
        z = z + b2_ref[...]

    # ---- log_softmax over real class columns (padded lanes masked) ------
    lane = jax.lax.broadcasted_iota(jnp.int32, z.shape, dimension=1)
    valid = lane < n_class
    z = jnp.where(valid, z, jnp.float32(-1e30))
    m = jnp.max(z, axis=-1, keepdims=True)
    e = jnp.exp(z - m)                       # masked lanes underflow to 0
    s = jnp.sum(e, axis=-1, keepdims=True)
    out = z - m - jnp.log(s)
    o_ref[...] = jnp.where(valid, out, 0.0).astype(o_ref.dtype)


def _gcn_forward_fused(x_p, adj_p, w1_p, b1_p, w2_p, b2_p, *, n_class,
                       with_relu, with_bias, vmem_limit):
    n_p, f_in_p = x_p.shape
    f_hid_p = w1_p.shape[1]
    f_cls_p = w2_p.shape[1]

    flops = 2 * (n_p * f_in_p * f_hid_p + n_p * n_p * f_hid_p
                 + n_p * f_hid_p * f_cls_p + n_p * n_p * f_cls_p)
    transcendentals = n_p * f_cls_p + n_p
    bytes_accessed = (x_p.size * 2 + adj_p.size * 2 + w1_p.size * 2
                      + w2_p.size * 2 + b1_p.size * 4 + b2_p.size * 4
                      + n_p * f_cls_p * 4)

    vmem_spec = pl.BlockSpec(memory_space=pltpu.MemorySpace.VMEM)
    kernel = functools.partial(_gcn_fused_kernel, n_class=n_class,
                               with_relu=with_relu, with_bias=with_bias)
    return pl.pallas_call(
        kernel,
        out_shape=jax.ShapeDtypeStruct((n_p, f_cls_p), jnp.float32),
        in_specs=[vmem_spec] * 6,
        out_specs=vmem_spec,
        compiler_params=pltpu.CompilerParams(vmem_limit_bytes=vmem_limit),
        cost_estimate=pl.CostEstimate(
            flops=flops, transcendentals=transcendentals,
            bytes_accessed=bytes_accessed),
    )(x_p, adj_p, w1_p, b1_p, w2_p, b2_p)


# -----------------------------------------------------------------------------
# Row-tiled path for graphs whose adjacency does not fit scoped VMEM.
# Grid over output-row blocks; adj row blocks are auto double-buffered and the
# row axis is "parallel" so v7x's two TensorCores split the work.
# -----------------------------------------------------------------------------
def _feature_transform_kernel(x_ref, w_ref, o_ref):
    o_ref[...] = jnp.dot(x_ref[...], w_ref[...],
                         preferred_element_type=jnp.float32).astype(o_ref.dtype)


def _aggregate_kernel(adj_ref, xw_ref, b_ref, o_ref, *, with_relu, with_bias):
    acc = jnp.dot(adj_ref[...], xw_ref[...], preferred_element_type=jnp.float32)
    if with_bias:
        acc = acc + b_ref[...]
    if with_relu:
        acc = jnp.maximum(acc, 0.0)
    o_ref[...] = acc.astype(o_ref.dtype)


def _aggregate_logsoftmax_kernel(adj_ref, hw_ref, b_ref, o_ref, *, n_class,
                                 with_bias):
    z = jnp.dot(adj_ref[...], hw_ref[...], preferred_element_type=jnp.float32)
    if with_bias:
        z = z + b_ref[...]
    lane = jax.lax.broadcasted_iota(jnp.int32, z.shape, dimension=1)
    valid = lane < n_class
    z = jnp.where(valid, z, jnp.float32(-1e30))
    m = jnp.max(z, axis=-1, keepdims=True)
    e = jnp.exp(z - m)
    s = jnp.sum(e, axis=-1, keepdims=True)
    o_ref[...] = jnp.where(valid, z - m - jnp.log(s), 0.0).astype(o_ref.dtype)


def _gcn_forward_tiled(x_p, adj_p, w1_p, b1_p, w2_p, b2_p, *, n_class,
                       with_relu, with_bias, tile_m, vmem_limit):
    n_p, f_in_p = x_p.shape
    f_hid_p = w1_p.shape[1]
    f_cls_p = w2_p.shape[1]

    tm = min(tile_m, n_p)
    if n_p % tm != 0:
        tm = LANE                      # n_p is always a multiple of 128
    grid = (n_p // tm,)
    cparams = pltpu.CompilerParams(
        dimension_semantics=("parallel",),
        vmem_limit_bytes=vmem_limit)

    def row_tiled(cols):
        return pl.BlockSpec((tm, cols), lambda i: (i, 0))

    def resident(shape):
        return pl.BlockSpec(shape, lambda i: (0, 0))

    # layer 1: xw = x @ W1 (bf16 intermediate), h = relu(A @ xw + b1)
    xw = pl.pallas_call(
        _feature_transform_kernel,
        out_shape=jax.ShapeDtypeStruct((n_p, f_hid_p), jnp.bfloat16),
        grid=grid,
        in_specs=[row_tiled(f_in_p), resident((f_in_p, f_hid_p))],
        out_specs=row_tiled(f_hid_p),
        compiler_params=cparams,
    )(x_p, w1_p)

    h = pl.pallas_call(
        functools.partial(_aggregate_kernel, with_relu=with_relu,
                          with_bias=with_bias),
        out_shape=jax.ShapeDtypeStruct((n_p, f_hid_p), jnp.bfloat16),
        grid=grid,
        in_specs=[row_tiled(n_p), resident((n_p, f_hid_p)),
                  resident((1, f_hid_p))],
        out_specs=row_tiled(f_hid_p),
        compiler_params=cparams,
    )(adj_p, xw, b1_p)

    # layer 2: hw = h @ W2, out = log_softmax(A @ hw + b2)
    hw = pl.pallas_call(
        _feature_transform_kernel,
        out_shape=jax.ShapeDtypeStruct((n_p, f_cls_p), jnp.bfloat16),
        grid=grid,
        in_specs=[row_tiled(f_hid_p), resident((f_hid_p, f_cls_p))],
        out_specs=row_tiled(f_cls_p),
        compiler_params=cparams,
    )(h, w2_p)

    out = pl.pallas_call(
        functools.partial(_aggregate_logsoftmax_kernel, n_class=n_class,
                          with_bias=with_bias),
        out_shape=jax.ShapeDtypeStruct((n_p, f_cls_p), jnp.float32),
        grid=grid,
        in_specs=[row_tiled(n_p), resident((n_p, f_cls_p)),
                  resident((1, f_cls_p))],
        out_specs=row_tiled(f_cls_p),
        compiler_params=cparams,
    )(adj_p, hw, b2_p)

    return out


# -----------------------------------------------------------------------------
# Public wrapper.  prepare_graph() pads + casts the N^2 adjacency ONCE; the
# jitted forward only pads the tiny weights and picks resident vs tiled.
# -----------------------------------------------------------------------------
def prepare_graph(x, adj):
    n, f_in = x.shape
    n_p = _round_up(n, LANE)
    f_in_p = _round_up(f_in, LANE)
    x_p = _pad2d(x, n_p, f_in_p).astype(jnp.bfloat16)
    adj_p = _pad2d(adj, n_p, n_p).astype(jnp.bfloat16)   # pad BEFORE the cast
    return x_p, adj_p


@functools.partial(jax.jit, static_argnames=(
    "n", "n_class", "with_relu", "with_bias", "force_tiled", "tile_m",
    "vmem_limit"))
def gcn_forward(x_p, adj_p, params, *, n, n_class, with_relu=True,
                with_bias=True, force_tiled=False, tile_m=256,
                vmem_limit=64 * 1024 * 1024):
    w1, b1, w2, b2 = params
    n_p = adj_p.shape[0]
    f_in_p = x_p.shape[1]
    f_hid = w1.shape[1]
    f_hid_p = _round_up(f_hid, LANE)
    f_cls_p = _round_up(n_class, LANE)

    w1_p = _pad2d(w1, f_in_p, f_hid_p).astype(jnp.bfloat16)
    w2_p = _pad2d(w2, f_hid_p, f_cls_p).astype(jnp.bfloat16)
    b1_p = _pad2d(b1, 1, f_hid_p).astype(jnp.float32)
    b2_p = _pad2d(b2, 1, f_cls_p).astype(jnp.float32)

    # Resident-fused (adj read once, highest AI — best on v5e/v6e) while the
    # footprint fits the raised scoped-VMEM budget; otherwise row-tiled
    # (double-buffered adj DMA + megacore-parallel row axis).
    resident_bytes = (2 * (adj_p.size + x_p.size)
                      + 4 * n_p * (f_hid_p + f_cls_p)
                      + 2 * (w1_p.size + w2_p.size))
    use_tiled = force_tiled or (resident_bytes > int(0.6 * vmem_limit))

    kwargs = dict(n_class=n_class, with_relu=with_relu, with_bias=with_bias,
                  vmem_limit=vmem_limit)
    if use_tiled:
        out_p = _gcn_forward_tiled(x_p, adj_p, w1_p, b1_p, w2_p, b2_p,
                                   tile_m=tile_m, **kwargs)
    else:
        out_p = _gcn_forward_fused(x_p, adj_p, w1_p, b1_p, w2_p, b2_p, **kwargs)

    return out_p[:n, :n_class]


# -----------------------------------------------------------------------------
# Pure-JAX f32 reference (forward semantics of the PyTorch module).
# -----------------------------------------------------------------------------
def gcn_reference(x, adj, params, with_relu=True, with_bias=True):
    w1, b1, w2, b2 = params
    h = adj @ (x @ w1)
    if with_bias:
        h = h + b1
    if with_relu:
        h = jnp.maximum(h, 0.0)
    z = adj @ (h @ w2)
    if with_bias:
        z = z + b2
    return jax.nn.log_softmax(z, axis=-1)


# -----------------------------------------------------------------------------
# Deterministic setup (synthetic graph + Glorot-style weights)
# -----------------------------------------------------------------------------
def build_normalized_adj(key, n_nodes):
    """Dense symmetric-normalized adjacency: D^{-1/2} (A + I) D^{-1/2}."""
    raw = jax.random.uniform(key, (n_nodes, n_nodes))
    a = (raw > 0.7).astype(jnp.float32)
    a = jnp.maximum(a, a.T)
    a = a + jnp.eye(n_nodes, dtype=jnp.float32)
    deg = jnp.sum(a, axis=1)
    d_inv_sqrt = 1.0 / jnp.sqrt(deg)
    return a * d_inv_sqrt[:, None] * d_inv_sqrt[None, :]


def init_params(key, n_feat, n_hidden, n_class):
    k1, k2 = jax.random.split(key)
    s1 = jnp.sqrt(6.0 / (n_feat + n_hidden))
    s2 = jnp.sqrt(6.0 / (n_hidden + n_class))
    w1 = jax.random.uniform(k1, (n_feat, n_hidden), minval=-s1, maxval=s1,
                            dtype=jnp.float32)
    w2 = jax.random.uniform(k2, (n_hidden, n_class), minval=-s2, maxval=s2,
                            dtype=jnp.float32)
    b1 = jnp.zeros((1, n_hidden), jnp.float32)
    b2 = jnp.zeros((1, n_class), jnp.float32)
    return w1, b1, w2, b2


if __name__ == "__main__":
    N_NODES, N_FEAT, N_HIDDEN, N_CLASS = 16, 32, 16, 8

    key = jax.random.PRNGKey(0)
    k_x, k_adj, k_w = jax.random.split(key, 3)

    x = jax.random.normal(k_x, (N_NODES, N_FEAT), dtype=jnp.float32)
    adj = build_normalized_adj(k_adj, N_NODES)
    params = init_params(k_w, N_FEAT, N_HIDDEN, N_CLASS)

    # Hoisted, cached graph preprocessing (done once, reused across forwards).
    x_p, adj_p = prepare_graph(x, adj)
    vmem_limit = _tpu_vmem_limit_bytes()
    tile_m = _default_tile_m()

    common = dict(n=N_NODES, n_class=N_CLASS, with_relu=True, with_bias=True,
                  tile_m=tile_m, vmem_limit=vmem_limit)

    out_fused = gcn_forward(x_p, adj_p, params, force_tiled=False, **common)
    out_fused = jax.block_until_ready(out_fused)

    out_tiled = gcn_forward(x_p, adj_p, params, force_tiled=True, **common)
    out_tiled = jax.block_until_ready(out_tiled)

    ref = gcn_reference(x, adj, params)

    for out in (out_fused, out_tiled):
        assert out.shape == (N_NODES, N_CLASS)
        assert bool(jnp.all(jnp.isfinite(out)))
        row_sums = jnp.sum(jnp.exp(out), axis=-1)
        assert bool(jnp.all(jnp.abs(row_sums - 1.0) < 1e-3)), row_sums
        # bf16 MXU operands with f32 accumulation vs f32 reference
        assert bool(jnp.max(jnp.abs(out - ref)) < 1e-1), jnp.max(jnp.abs(out - ref))

    # fused and tiled paths apply identical casts -> should agree tightly
    assert bool(jnp.max(jnp.abs(out_fused - out_tiled)) < 1e-2)

    print("KERNEL_OK")
</pallas_src>

<mosaic_0001>
module attributes {stable_mosaic.version = 11 : i64} {
  func.func @_gcn_fused_kernel(%arg0: memref<128x128xbf16, #tpu.memory_space<vmem>>, %arg1: memref<128x128xbf16, #tpu.memory_space<vmem>>, %arg2: memref<128x128xbf16, #tpu.memory_space<vmem>>, %arg3: memref<1x128xf32, #tpu.memory_space<vmem>>, %arg4: memref<128x128xbf16, #tpu.memory_space<vmem>>, %arg5: memref<1x128xf32, #tpu.memory_space<vmem>>, %arg6: memref<128x128xf32, #tpu.memory_space<vmem>>) attributes {dimension_semantics = [], scalar_prefetch = 0 : i64, scratch_operands = 0 : i64, tpu.core_type = #tpu.core_type<tc>} {
    %c0 = arith.constant 0 : index
    %c0_0 = arith.constant 0 : index
    %0 = vector.load %arg0[%c0, %c0_0] : memref<128x128xbf16, #tpu.memory_space<vmem>>, vector<128x128xbf16>
    %c0_1 = arith.constant 0 : index
    %c0_2 = arith.constant 0 : index
    %1 = vector.load %arg2[%c0_1, %c0_2] : memref<128x128xbf16, #tpu.memory_space<vmem>>, vector<128x128xbf16>
    %cst = arith.constant dense<0.000000e+00> : vector<128x128xf32>
    %2 = tpu.matmul %0, %1, %cst {dimension_numbers = #tpu.dot_dimension_numbers<[1], [0], [0], [1], [0, 0, 1, 1], [], []>} : vector<128x128xbf16>, vector<128x128xbf16>, vector<128x128xf32> -> vector<128x128xf32>
    %c0_3 = arith.constant 0 : index
    %c0_4 = arith.constant 0 : index
    %3 = vector.load %arg1[%c0_3, %c0_4] : memref<128x128xbf16, #tpu.memory_space<vmem>>, vector<128x128xbf16>
    %4 = arith.truncf %2 : vector<128x128xf32> to vector<128x128xbf16>
    %cst_5 = arith.constant dense<0.000000e+00> : vector<128x128xf32>
    %5 = tpu.matmul %3, %4, %cst_5 {dimension_numbers = #tpu.dot_dimension_numbers<[1], [0], [0], [1], [0, 0, 1, 1], [], []>} : vector<128x128xbf16>, vector<128x128xbf16>, vector<128x128xf32> -> vector<128x128xf32>
    %c0_6 = arith.constant 0 : index
    %c0_7 = arith.constant 0 : index
    %6 = vector.load %arg3[%c0_6, %c0_7] : memref<1x128xf32, #tpu.memory_space<vmem>>, vector<1x128xf32>
    %7 = vector.broadcast %6 : vector<1x128xf32> to vector<128x128xf32>
    %8 = arith.addf %5, %7 : vector<128x128xf32>
    %cst_8 = arith.constant 0.000000e+00 : f32
    %9 = vector.broadcast %cst_8 : f32 to vector<128x128xf32>
    %10 = arith.maximumf %8, %9 : vector<128x128xf32>
    %11 = arith.truncf %10 : vector<128x128xf32> to vector<128x128xbf16>
    %c0_9 = arith.constant 0 : index
    %c0_10 = arith.constant 0 : index
    %12 = vector.load %arg4[%c0_9, %c0_10] : memref<128x128xbf16, #tpu.memory_space<vmem>>, vector<128x128xbf16>
    %cst_11 = arith.constant dense<0.000000e+00> : vector<128x128xf32>
    %13 = tpu.matmul %11, %12, %cst_11 {dimension_numbers = #tpu.dot_dimension_numbers<[1], [0], [0], [1], [0, 0, 1, 1], [], []>} : vector<128x128xbf16>, vector<128x128xbf16>, vector<128x128xf32> -> vector<128x128xf32>
    %c0_12 = arith.constant 0 : index
    %c0_13 = arith.constant 0 : index
    %14 = vector.load %arg1[%c0_12, %c0_13] : memref<128x128xbf16, #tpu.memory_space<vmem>>, vector<128x128xbf16>
    %15 = arith.truncf %13 : vector<128x128xf32> to vector<128x128xbf16>
    %cst_14 = arith.constant dense<0.000000e+00> : vector<128x128xf32>
    %16 = tpu.matmul %14, %15, %cst_14 {dimension_numbers = #tpu.dot_dimension_numbers<[1], [0], [0], [1], [0, 0, 1, 1], [], []>} : vector<128x128xbf16>, vector<128x128xbf16>, vector<128x128xf32> -> vector<128x128xf32>
    %c0_15 = arith.constant 0 : index
    %c0_16 = arith.constant 0 : index
    %17 = vector.load %arg5[%c0_15, %c0_16] : memref<1x128xf32, #tpu.memory_space<vmem>>, vector<1x128xf32>
    %18 = vector.broadcast %17 : vector<1x128xf32> to vector<128x128xf32>
    %19 = arith.addf %16, %18 : vector<128x128xf32>
    %20 = tpu.iota {dimensions = array<i32: 1>} : vector<128x128xi32>
    %c8_i32 = arith.constant 8 : i32
    %21 = vector.broadcast %c8_i32 : i32 to vector<128x128xi32>
    %22 = arith.cmpi slt, %20, %21 : vector<128x128xi32>
    %cst_17 = arith.constant -1.000000e+30 : f32
    %23 = vector.broadcast %cst_17 : f32 to vector<128x128xf32>
    %24 = arith.select %22, %19, %23 : vector<128x128xi1>, vector<128x128xf32>
    %cst_18 = arith.constant dense<0xFF800000> : vector<128xf32>
    %25 = vector.multi_reduction <maximumf>, %24, %cst_18 [1] : vector<128x128xf32> to vector<128xf32>
    %26 = vector.shape_cast %25 : vector<128xf32> to vector<128x1xf32>
    %27 = vector.broadcast %26 : vector<128x1xf32> to vector<128x128xf32>
    %28 = arith.subf %24, %27 : vector<128x128xf32>
    %29 = math.exp %28 : vector<128x128xf32>
    %cst_19 = arith.constant dense<0.000000e+00> : vector<128xf32>
    %30 = vector.multi_reduction <add>, %29, %cst_19 [1] : vector<128x128xf32> to vector<128xf32>
    %31 = vector.shape_cast %30 : vector<128xf32> to vector<128x1xf32>
    %32 = vector.broadcast %26 : vector<128x1xf32> to vector<128x128xf32>
    %33 = arith.subf %24, %32 : vector<128x128xf32>
    %34 = math.log %31 : vector<128x1xf32>
    %35 = vector.broadcast %34 : vector<128x1xf32> to vector<128x128xf32>
    %36 = arith.subf %33, %35 : vector<128x128xf32>
    %cst_20 = arith.constant 0.000000e+00 : f32
    %37 = vector.broadcast %cst_20 : f32 to vector<128x128xf32>
    %38 = arith.select %22, %36, %37 : vector<128x128xi1>, vector<128x128xf32>
    %c0_21 = arith.constant 0 : index
    %c0_22 = arith.constant 0 : index
    %39 = vector.load %arg6[%c0_21, %c0_22] : memref<128x128xf32, #tpu.memory_space<vmem>>, vector<128x128xf32>
    tpu.vector_store %arg6[%c0_21, %c0_22], %38 {strides = array<i32>} : memref<128x128xf32, #tpu.memory_space<vmem>>, vector<128x128xf32>,
    return
  }
}

</mosaic_0001>

<bundles_post_ra>
// kernel: gcn_forward.1
= control target key start
LH: loop header
LB: loop body
LE: loop exit
PB: predicated region body
PF: predicated region fallthrough
CT: control target
= control target key end

     0   :  { %11 = vsyncpa [#allocation3], 0  ;;  %s1873_s0 = inlined_call_operand.hbm [shape: bf16[128,128], index: 0, kind: input, shape index: {}]   ;;  %s1874_s1 = inlined_call_operand.hbm [shape: bf16[128,128], index: 1, kind: input, shape index: {}]   ;;  %s1875_s2 = inlined_call_operand.hbm [shape: bf16[128,128], index: 2, kind: input, shape index: {}]   ;;  %s1876_s3 = inlined_call_operand.hbm [shape: f32[1,128], index: 3, kind: input, shape index: {}]   ;;  %s1877_s4 = inlined_call_operand.hbm [shape: bf16[128,128], index: 4, kind: input, shape index: {}]   ;;  %s1878_s5 = inlined_call_operand.hbm [shape: f32[1,128], index: 5, kind: input, shape index: {}]   ;;  %s1879_s6 = inlined_call_operand.hbm [shape: f32[128,128], index: 6, kind: output, shape index: {}]  }
   0x1   :  { %12 = vsyncpa [#allocation6], 0 }
   0x2   :  { %13 = vsyncpa [#allocation9], 0 }
   0x3   :  { %14 = vsyncpa [#allocation12], 0 }
   0x4   :  { %15 = vsyncpa [#allocation4], 0  ;;  %s1529_s21 = smov [#allocation5]   ;;  %s1530_s23 = smov [#allocation8]  }
   0x5   :  { %s33_s22 = sshll.u32 %s1529_s21, 4  ;;  %s58_s24 = sshll.u32 %s1530_s23, 4  ;;  %s34_s22 = int_to_ptr.vmem [resolvable:$true] %s33_s22  ;;  %s1575_s24 = int_to_ptr.vmem [resolvable:$true] %s58_s24 }
   0x6   :  { %s1365_s27 = scalar_lea.hbm %s1874_s1, 1024 }
   0x7   :  { %p1366_p0 = scmp.ne.s32.totalorder %s1874_s1, %s1365_s27  ;;  %p1369_p1 = scmp.lt.u32.totalorder %s1365_s27, %s1874_s1 }
   0x9   :  { %p1371_p2 = pnand %p1369_p1, %p1366_p0 }
   0xb   :  { %1374 = shalt.err (!%p1371_p2)
}
   0xc   :  { %s1375_s8 = scalar_lea.vmem %s34_s22, 1024  ;;  %p1380_p4 = scmp.lt.s32.totalorder %s34_s22, %s34_s22 }
   0xd   :  { %p1376_p3 = scmp.ne.s32.totalorder %s34_s22, %s1375_s8  ;;  %p1381_p5 = scmp.lt.s32.totalorder %s1375_s8, %s1375_s8 }
   0xf   :  { %p1382_p6 = por %p1381_p5, %p1380_p4 }
  0x11   :  { %p1383_p7 = pnand %p1382_p6, %p1376_p3 }
  0x13   :  { %1386 = shalt.err (!%p1383_p7)
}
  0x14   :  { %s1531_s9 = smov 64   ;;  %s1532_s10 = smov 4  }
  0x15   :  { %39 = dma.hbm_to_vmem [thread:$0]  %s1874_s1, 1024, %s34_s22, [#allocation6], %s1531_s9, %s1531_s9, %s1532_s10  }
  0x16   :  { %s1387_s15 = scalar_lea.hbm %s1876_s3, 16 }
  0x17   :  { %p1388_p8 = scmp.ne.s32.totalorder %s1876_s3, %s1387_s15  ;;  %p1391_p9 = scmp.lt.u32.totalorder %s1387_s15, %s1876_s3 }
  0x19   :  { %p1393_p10 = pnand %p1391_p9, %p1388_p8 }
  0x1b   :  { %1396 = shalt.err (!%p1393_p10)
}
  0x1c   :  { %s1397_s20 = scalar_lea.vmem %s1575_s24, 16  ;;  %s1401_s1 = scalar_lea.vmem %s1575_s24, 32 }
  0x1d   :  { %p1398_p11 = scmp.ne.s32.totalorder %s1575_s24, %s1397_s20  ;;  %p1402_p12 = scmp.lt.s32.totalorder %s1575_s24, %s1575_s24 }
  0x1e   :  { %p1403_p13 = scmp.lt.s32.totalorder %s1401_s1, %s1397_s20 }
  0x20   :  { %p1404_p0 = por %p1403_p13, %p1402_p12 }
  0x22   :  { %p1405_p1 = pnand %p1404_p0, %p1398_p11 }
  0x24   :  { %1408 = shalt.err (!%p1405_p1)
}
  0x25   :  { %61 = dma.hbm_to_vmem [thread:$0]  %s1876_s3, 16, %s1575_s24, [#allocation9]  }
  0x26   :  { %s1533_s23 = smov [#allocation2]   ;;  %s1534_s26 = smov [#allocation7]  }
  0x27   :  { %s21_s25 = sshll.u32 %s1533_s23, 4  ;;  %s45_s27 = sshll.u32 %s1534_s26, 4  ;;  %s22_s25 = int_to_ptr.vmem [resolvable:$true] %s21_s25  ;;  %s1610_s27 = int_to_ptr.vmem [resolvable:$true] %s45_s27 }
  0x28   :  { %s1409_s30 = scalar_lea.hbm %s1873_s0, 1024 }
  0x29   :  { %p1410_p2 = scmp.ne.s32.totalorder %s1873_s0, %s1409_s30  ;;  %p1413_p3 = scmp.lt.u32.totalorder %s1409_s30, %s1873_s0 }
  0x2b   :  { %p1415_p4 = pnand %p1413_p3, %p1410_p2 }
  0x2d   :  { %1418 = shalt.err (!%p1415_p4)
}
  0x2e   :  { %s1419_s3 = scalar_lea.vmem %s22_s25, 1024  ;;  %p1424_p6 = scmp.lt.s32.totalorder %s22_s25, %s22_s25 }
  0x2f   :  { %p1420_p5 = scmp.ne.s32.totalorder %s22_s25, %s1419_s3  ;;  %p1425_p7 = scmp.lt.s32.totalorder %s1419_s3, %s1419_s3 }
  0x31   :  { %p1426_p8 = por %p1425_p7, %p1424_p6 }
  0x33   :  { %p1427_p9 = pnand %p1426_p8, %p1420_p5 }
  0x35   :  { %1430 = shalt.err (!%p1427_p9)
}
  0x36   :  { %27 = dma.hbm_to_vmem [thread:$0]  %s1873_s0, 1024, %s22_s25, [#allocation3], %s1531_s9, %s1531_s9, %s1532_s10  }
  0x37   :  { %s1431_s16 = scalar_lea.hbm %s1875_s2, 1024 }
  0x38   :  { %p1432_p10 = scmp.ne.s32.totalorder %s1875_s2, %s1431_s16  ;;  %p1435_p11 = scmp.lt.u32.totalorder %s1431_s16, %s1875_s2 }
  0x3a   :  { %p1437_p12 = pnand %p1435_p11, %p1432_p10 }
  0x3c   :  { %1440 = shalt.err (!%p1437_p12)
}
  0x3d   :  { %s1441_s1 = scalar_lea.vmem %s1610_s27, 1024  ;;  %p1446_p0 = scmp.lt.s32.totalorder %s1610_s27, %s1610_s27 }
  0x3e   :  { %p1442_p13 = scmp.ne.s32.totalorder %s1610_s27, %s1441_s1  ;;  %p1447_p1 = scmp.lt.s32.totalorder %s1441_s1, %s1441_s1 }
  0x40   :  { %p1448_p2 = por %p1447_p1, %p1446_p0 }
  0x42   :  { %p1449_p3 = pnand %p1448_p2, %p1442_p13 }
  0x44   :  { %1452 = shalt.err (!%p1449_p3)
}
  0x45   :  { %51 = dma.hbm_to_vmem [thread:$0]  %s1875_s2, 1024, %s1610_s27, [#allocation6], %s1531_s9, %s1531_s9, %s1532_s10  }
  0x46   :  { %s1535_s22 = smov [#allocation10]   ;;  %s1536_s25 = smov [#allocation11]  }
  0x47   :  { %s67_s23 = sshll.u32 %s1535_s22, 4  ;;  %s80_s26 = sshll.u32 %s1536_s25, 4  ;;  %s68_s23 = int_to_ptr.vmem [resolvable:$true] %s67_s23  ;;  %s81_s26 = int_to_ptr.vmem [resolvable:$true] %s80_s26 }
  0x48   :  { %s1453_s30 = scalar_lea.hbm %s1877_s4, 1024 }
  0x49   :  { %p1454_p4 = scmp.ne.s32.totalorder %s1877_s4, %s1453_s30  ;;  %p1457_p5 = scmp.lt.u32.totalorder %s1453_s30, %s1877_s4 }
  0x4b   :  { %p1459_p6 = pnand %p1457_p5, %p1454_p4 }
  0x4d   :  { %1462 = shalt.err (!%p1459_p6)
}
  0x4e   :  { %s1463_s2 = scalar_lea.vmem %s68_s23, 1024  ;;  %p1468_p8 = scmp.lt.s32.totalorder %s68_s23, %s68_s23 }
  0x4f   :  { %p1464_p7 = scmp.ne.s32.totalorder %s68_s23, %s1463_s2  ;;  %p1469_p9 = scmp.lt.s32.totalorder %s1463_s2, %s1463_s2 }
  0x51   :  { %p1470_p10 = por %p1469_p9, %p1468_p8 }
  0x53   :  { %p1471_p11 = pnand %p1470_p10, %p1464_p7 }
  0x55   :  { %1474 = shalt.err (!%p1471_p11)
}
  0x56   :  { %73 = dma.hbm_to_vmem [thread:$0]  %s1877_s4, 1024, %s68_s23, [#allocation9], %s1531_s9, %s1531_s9, %s1532_s10  }
  0x57   :  { %s1475_s14 = scalar_lea.hbm %s1878_s5, 16 }
  0x58   :  { %p1476_p12 = scmp.ne.s32.totalorder %s1878_s5, %s1475_s14  ;;  %p1479_p13 = scmp.lt.u32.totalorder %s1475_s14, %s1878_s5 }
  0x5a   :  { %p1481_p0 = pnand %p1479_p13, %p1476_p12 }
  0x5c   :  { %1484 = shalt.err (!%p1481_p0)
}
  0x5d   :  { %s1485_s19 = scalar_lea.vmem %s81_s26, 16  ;;  %s1489_s20 = scalar_lea.vmem %s81_s26, 32 }
  0x5e   :  { %p1486_p1 = scmp.ne.s32.totalorder %s81_s26, %s1485_s19  ;;  %p1490_p2 = scmp.lt.s32.totalorder %s81_s26, %s81_s26 }
  0x5f   :  { %p1491_p3 = scmp.lt.s32.totalorder %s1489_s20, %s1485_s19 }
  0x61   :  { %p1492_p4 = por %p1491_p3, %p1490_p2 }
  0x63   :  { %p1493_p5 = pnand %p1492_p4, %p1486_p1 }
  0x65   :  { %1496 = shalt.err (!%p1493_p5)
}
  0x66   :  { %83 = dma.hbm_to_vmem [thread:$0]  %s1878_s5, 16, %s81_s26, [#allocation12]  }
  0x67   :  { %1519 = dma.done.wait [#allocation3], 1024  }
  0x68   :  { %1520 = vsyncadd [#allocation3], 4294966272 }
  0x69   :  { %1521 = dma.done.wait [#allocation6], 2048  }
  0x6a   :  { %1522 = vsyncadd [#allocation6], 4294965248 }
  0x6b   :  { %1523 = dma.done.wait [#allocation9], 1040  }
  0x6c   :  { %1524 = vsyncadd [#allocation9], 4294966256 }
  0x6d   :  { %1525 = dma.done.wait [#allocation12], 16  }
  0x6e   :  { %1526 = vsyncadd [#allocation12], 4294967280  ;;  %v1269_v0 = vld [vmem:[#allocation7] sm:$0xff]   ;;  %v1270_v1 = vld [vmem:[#allocation7 + $0x8] sm:$0xff]   ;;  %s1537_s5 = smov [#allocation13]  }
  0x6f   :  { %1130 = vmatprep.subr.bf16.mxu0 %v1269_v0  ;;  %v1271_v2 = vld [vmem:[#allocation7 + $0x10] sm:$0xff]   ;;  %v1272_v3 = vld [vmem:[#allocation7 + $0x18] sm:$0xff]   ;;  %v1277_v4 = vld [vmem:[#allocation2] sm:$0xff]   ;;  %s1017_s10 = sshll.u32 %s1537_s5, 4  ;;  %s1018_s10 = int_to_ptr.vmem [resolvable:$true] %s1017_s10 }
  0x70   :  { %1131 = vmatpush3.bf16.msra.mxu0 %v1269_v0  ;;  %1146 = vmatprep.mubr.bf16.mxu0 %v1277_v4  ;;  %v1273_v5 = vld [vmem:[#allocation7 + $0x20] sm:$0xff]   ;;  %v1274_v6 = vld [vmem:[#allocation7 + $0x28] sm:$0xff]   ;;  %v1275_v7 = vld [vmem:[#allocation7 + $0x30] sm:$0xff]   ;;  %s1497_s1 = scalar_lea.vmem %s1018_s10, 2048  ;;  %p1502_p7 = scmp.lt.s32.totalorder %s1018_s10, %s1018_s10 }
  0x71   :  { %1132 = vmatprep.subr.bf16.mxu0 %v1270_v1  ;;  %v1276_v8 = vld [vmem:[#allocation7 + $0x38] sm:$0xff]   ;;  %v1278_v9 = vld [vmem:[#allocation2 + $0x8] sm:$0xff]   ;;  %v1279_v10 = vld [vmem:[#allocation2 + $0x10] sm:$0xff]   ;;  %p1498_p6 = scmp.ne.s32.totalorder %s1018_s10, %s1497_s1  ;;  %p1503_p8 = scmp.lt.s32.totalorder %s1497_s1, %s1497_s1 }
  0x72   :  { %v1280_v11 = vld [vmem:[#allocation2 + $0x18] sm:$0xff]   ;;  %v1281_v12 = vld [vmem:[#allocation2 + $0x20] sm:$0xff]   ;;  %v1282_v13 = vld [vmem:[#allocation2 + $0x28] sm:$0xff]  }
  0x73   :  { %v1283_v14 = vld [vmem:[#allocation2 + $0x30] sm:$0xff]   ;;  %v1284_v15 = vld [vmem:[#allocation2 + $0x38] sm:$0xff]   ;;  %v1674_v16 = vld [vmem:[#allocation5] sm:$0xff]   ;;  %p1504_p9 = por %p1503_p8, %p1502_p7 }
  0x74   :  { %1133 = vmatpush3.bf16.msra.mxu0 %v1270_v1  ;;  %1178 = vmatprep.mubr.bf16.mxu1 %v1674_v16  ;;  %v1293_v17 = vld [vmem:[#allocation10] sm:$0xff]   ;;  %v1294_v18 = vld [vmem:[#allocation10 + $0x8] sm:$0xff]   ;;  %v1295_v19 = vld [vmem:[#allocation10 + $0x10] sm:$0xff]  }
  0x75   :  { %1134 = vmatprep.subr.bf16.mxu0 %v1271_v2  ;;  %v1296_v20 = vld [vmem:[#allocation10 + $0x18] sm:$0xff]   ;;  %v1297_v21 = vld [vmem:[#allocation10 + $0x20] sm:$0xff]   ;;  %v1298_v22 = vld [vmem:[#allocation10 + $0x28] sm:$0xff]   ;;  %p1505_p10 = pnand %p1504_p9, %p1498_p6 }
  0x76   :  { %v1677_v47 = vld [vmem:[#allocation5 + $0x8] sm:$0xff]   ;;  %v1679_v48 = vld [vmem:[#allocation5 + $0x10] sm:$0xff]   ;;  %v1683_v49 = vld [vmem:[#allocation5 + $0x18] sm:$0xff]  }
  0x77   :  { %v1685_v50 = vld [vmem:[#allocation5 + $0x20] sm:$0xff]   ;;  %v1689_v51 = vld [vmem:[#allocation5 + $0x28] sm:$0xff]   ;;  %v1691_v52 = vld [vmem:[#allocation5 + $0x30] sm:$0xff]  }
  0x78   :  { %1135 = vmatpush3.bf16.msra.mxu0 %v1271_v2  ;;  %v1695_v53 = vld [vmem:[#allocation5 + $0x38] sm:$0xff]   ;;  %v1048_v56 = vld [vmem:[#allocation8] ss:$0 sm:$0xff] }
  0x79   :  { %1136 = vmatprep.subr.bf16.mxu0 %v1272_v3  ;;  %v1299_v54 = vld [vmem:[#allocation10 + $0x30] sm:$0xff]   ;;  %v1300_v55 = vld [vmem:[#allocation10 + $0x38] sm:$0xff]  }
  0x7c   :  { %1137 = vmatpush3.bf16.msra.mxu0 %v1272_v3 }
  0x7d   :  { %1138 = vmatprep.subr.bf16.mxu0 %v1273_v5 }
  0x80   :  { %1139 = vmatpush3.bf16.msra.mxu0 %v1273_v5 }
  0x81   :  { %1140 = vmatprep.subr.bf16.mxu0 %v1274_v6 }
  0x84   :  { %1141 = vmatpush3.bf16.msra.mxu0 %v1274_v6 }
  0x85   :  { %1142 = vmatprep.subr.bf16.mxu0 %v1275_v7 }
  0x88   :  { %1143 = vmatpush3.bf16.msra.mxu0 %v1275_v7 }
  0x89   :  { %1144 = vmatprep.subr.bf16.mxu0 %v1276_v8 }
  0x8c   :  { %1145 = vmatpush3.bf16.msra.mxu0 %v1276_v8 }
  0x8d   :  { %1194 = vmatprep.subr.bf16.mxu0 %v1293_v17 }
  0x8f   :  { %1147 = vmatmul.mubr.bf16.vlgmr.msra.gmra.mrb[0].mxu0 %v1278_v9 }
  0x90   :  { %1150 = vmatprep.mubr.bf16.mxu0 %v1279_v10  ;;  %1195 = vmatpush3.bf16.msra.mxu0 %v1293_v17 }
  0x91   :  { %1196 = vmatprep.subr.bf16.mxu0 %v1294_v18 }
  0x94   :  { %1197 = vmatpush3.bf16.msra.mxu0 %v1294_v18 }
  0x95   :  { %1198 = vmatprep.subr.bf16.mxu0 %v1295_v19 }
  0x97   :  { %1151 = vmatmul.mubr.bf16.gmra.mrb[4].mxu0 %v1280_v11 }
  0x98   :  { %1154 = vmatprep.mubr.bf16.mxu0 %v1281_v12  ;;  %1199 = vmatpush3.bf16.msra.mxu0 %v1295_v19 }
  0x99   :  { %1200 = vmatprep.subr.bf16.mxu0 %v1296_v20 }
  0x9c   :  { %1201 = vmatpush3.bf16.msra.mxu0 %v1296_v20 }
  0x9d   :  { %1202 = vmatprep.subr.bf16.mxu0 %v1297_v21 }
  0x9f   :  { %1155 = vmatmul.mubr.bf16.gmra.mrb[8].mxu0 %v1282_v13 }
  0xa0   :  { %1158 = vmatprep.mubr.bf16.mxu0 %v1283_v14  ;;  %1203 = vmatpush3.bf16.msra.mxu0 %v1297_v21 }
  0xa1   :  { %1204 = vmatprep.subr.bf16.mxu0 %v1298_v22 }
  0xa4   :  { %1205 = vmatpush3.bf16.msra.mxu0 %v1298_v22 }
  0xa5   :  { %1206 = vmatprep.subr.bf16.mxu0 %v1299_v54 }
  0xa7   :  { %1159 = vmatmul.mubr.bf16.gmra.mrb[12].mxu0 %v1284_v15 }
  0xa8   :  { %1207 = vmatpush3.bf16.msra.mxu0 %v1299_v54 }
  0xa9   :  { %1208 = vmatprep.subr.bf16.mxu0 %v1300_v55 }
  0xac   :  { %1209 = vmatpush3.bf16.msra.mxu0 %v1300_v55 }
 0x162   :  { %v1148_v23 = vpop.f32.mrb[0].mxu0 }
 0x163   :  { %v265_v24 = vpop.f32.mrb[1].mxu0 }
 0x164   :  { %v1149_v25 = vpop.f32.mrb[2].mxu0 }
 0x165   :  { %v345_v26 = vpack.c.bf16 %v1149_v25, %v1148_v23  ;;  %v268_v27 = vpop.f32.mrb[3].mxu0 }
 0x166   :  { %v344_v28 = vpack.c.bf16 %v268_v27, %v265_v24 }
 0x168   :  { %1162 = vmatprep.subr.bf16.mxu1 %v344_v28 }
 0x169   :  { %1163 = vmatpush3.bf16.msra.mxu1 %v344_v28 }
 0x16a   :  { %v1152_v29 = vpop.f32.mrb[4].mxu0  ;;  %1164 = vmatprep.subr.bf16.mxu1 %v345_v26 }
 0x16b   :  { %v281_v30 = vpop.f32.mrb[5].mxu0 }
 0x16c   :  { %v1153_v31 = vpop.f32.mrb[6].mxu0 }
 0x16d   :  { %v347_v32 = vpack.c.bf16 %v1153_v31, %v1152_v29  ;;  %v284_v33 = vpop.f32.mrb[7].mxu0  ;;  %1165 = vmatpush3.bf16.msra.mxu1 %v345_v26 }
 0x16e   :  { %v346_v34 = vpack.c.bf16 %v284_v33, %v281_v30 }
 0x170   :  { %1166 = vmatprep.subr.bf16.mxu1 %v346_v34 }
 0x171   :  { %1167 = vmatpush3.bf16.msra.mxu1 %v346_v34 }
 0x172   :  { %v1156_v35 = vpop.f32.mrb[8].mxu0  ;;  %1168 = vmatprep.subr.bf16.mxu1 %v347_v32 }
 0x173   :  { %v297_v36 = vpop.f32.mrb[9].mxu0 }
 0x174   :  { %v1157_v37 = vpop.f32.mrb[10].mxu0 }
 0x175   :  { %v349_v38 = vpack.c.bf16 %v1157_v37, %v1156_v35  ;;  %v300_v39 = vpop.f32.mrb[11].mxu0  ;;  %1169 = vmatpush3.bf16.msra.mxu1 %v347_v32 }
 0x176   :  { %v348_v40 = vpack.c.bf16 %v300_v39, %v297_v36 }
 0x178   :  { %1170 = vmatprep.subr.bf16.mxu1 %v348_v40 }
 0x179   :  { %1171 = vmatpush3.bf16.msra.mxu1 %v348_v40 }
 0x17a   :  { %v1160_v41 = vpop.f32.mrb[12].mxu0  ;;  %1172 = vmatprep.subr.bf16.mxu1 %v349_v38 }
 0x17b   :  { %v313_v42 = vpop.f32.mrb[13].mxu0 }
 0x17c   :  { %v1161_v43 = vpop.f32.mrb[14].mxu0 }
 0x17d   :  { %v351_v44 = vpack.c.bf16 %v1161_v43, %v1160_v41  ;;  %v316_v45 = vpop.f32.mrb[15].mxu0  ;;  %1173 = vmatpush3.bf16.msra.mxu1 %v349_v38 }
 0x17e   :  { %v350_v46 = vpack.c.bf16 %v316_v45, %v313_v42 }
 0x180   :  { %1174 = vmatprep.subr.bf16.mxu1 %v350_v46 }
 0x181   :  { %1175 = vmatpush3.bf16.msra.mxu1 %v350_v46 }
 0x182   :  { %1176 = vmatprep.subr.bf16.mxu1 %v351_v44 }
 0x185   :  { %1177 = vmatpush3.bf16.msra.mxu1 %v351_v44 }
 0x188   :  { %1179 = vmatmul.mubr.bf16.vlgmr.msra.gmra.mrb[0].mxu1 %v1677_v47 }
 0x189   :  { %1182 = vmatprep.mubr.bf16.mxu1 %v1679_v48 }
 0x190   :  { %1183 = vmatmul.mubr.bf16.gmra.mrb[4].mxu1 %v1683_v49 }
 0x191   :  { %1186 = vmatprep.mubr.bf16.mxu1 %v1685_v50 }
 0x198   :  { %1187 = vmatmul.mubr.bf16.gmra.mrb[8].mxu1 %v1689_v51 }
 0x199   :  { %1190 = vmatprep.mubr.bf16.mxu1 %v1691_v52 }
 0x1a0   :  { %1191 = vmatmul.mubr.bf16.gmra.mrb[12].mxu1 %v1695_v53 }
 0x1a1   :  { %1242 = vmatprep.mubr.bf16.mxu1 %v1674_v16 }
 0x25b   :  { %v1180_v57 = vpop.f32.mrb[0].mxu1 }
 0x25c   :  { %v450_v58 = vadd.f32 %v1180_v57, %v1048_v56  ;;  %v441_v59 = vpop.f32.mrb[1].mxu1 }
 0x25d   :  { %v442_v60 = vadd.f32 %v1048_v56, %v441_v59  ;;  %v1181_v61 = vpop.f32.mrb[2].mxu1 }
 0x25e   :  { %v453_v62 = vadd.f32 %v1181_v61, %v1048_v56  ;;  %v444_v63 = vpop.f32.mrb[3].mxu1  ;;  %v506_v1 = vmax.f32 %v450_v58, 0.0 }
 0x25f   :  { %v445_v0 = vadd.f32 %v1048_v56, %v444_v63  ;;  %v504_v3 = vmax.f32 %v442_v60, 0.0 }
 0x260   :  { %v507_v2 = vmax.f32 %v453_v62, 0.0 }
 0x261   :  { %v505_v4 = vmax.f32 %v445_v0, 0.0 }
 0x262   :  { %v521_v5 = vpack.c.bf16 %v507_v2, %v506_v1 }
 0x263   :  { %v520_v6 = vpack.c.bf16 %v505_v4, %v504_v3  ;;  %v1184_v7 = vpop.f32.mrb[4].mxu1 }
 0x264   :  { %v466_v8 = vadd.f32 %v1184_v7, %v1048_v56  ;;  %v457_v9 = vpop.f32.mrb[5].mxu1 }
 0x265   :  { %v458_v10 = vadd.f32 %v1048_v56, %v457_v9  ;;  %v1185_v11 = vpop.f32.mrb[6].mxu1  ;;  %1210 = vmatprep.mubr.bf16.mxu0 %v520_v6 }
 0x266   :  { %v469_v12 = vadd.f32 %v1185_v11, %v1048_v56  ;;  %v460_v13 = vpop.f32.mrb[7].mxu1  ;;  %1211 = vmatmul.mubr.bf16.vlgmr.msra.gmra.mrb[16].mxu0 %v521_v5  ;;  %v510_v15 = vmax.f32 %v466_v8, 0.0 }
 0x267   :  { %v461_v14 = vadd.f32 %v1048_v56, %v460_v13  ;;  %v508_v17 = vmax.f32 %v458_v10, 0.0 }
 0x268   :  { %v511_v16 = vmax.f32 %v469_v12, 0.0 }
 0x269   :  { %v509_v18 = vmax.f32 %v461_v14, 0.0 }
 0x26a   :  { %v523_v19 = vpack.c.bf16 %v511_v16, %v510_v15  ;;  %v801_v16 = vlaneseq }
 0x26b   :  { %v522_v20 = vpack.c.bf16 %v509_v18, %v508_v17  ;;  %v1188_v21 = vpop.f32.mrb[8].mxu1  ;;  %v1065_v18 = vld [vmem:[#allocation11] ss:$0 sm:$0xff] }
 0x26c   :  { %v482_v22 = vadd.f32 %v1188_v21, %v1048_v56  ;;  %v473_v23 = vpop.f32.mrb[9].mxu1  ;;  %v1706_v17 = vand.u32 127, %v801_v16 }
 0x26d   :  { %v474_v24 = vadd.f32 %v1048_v56, %v473_v23  ;;  %v1189_v25 = vpop.f32.mrb[10].mxu1  ;;  %1214 = vmatprep.mubr.bf16.mxu0 %v522_v20 }
 0x26e   :  { %v485_v26 = vadd.f32 %v1189_v25, %v1048_v56  ;;  %v476_v27 = vpop.f32.mrb[11].mxu1  ;;  %1215 = vmatmul.mubr.bf16.gmra.mrb[20].mxu0 %v523_v19  ;;  %v514_v29 = vmax.f32 %v482_v22, 0.0  ;;  %vm803_vm0 = vcmp.lt.s32.totalorder %v1706_v17, 8 }
 0x26f   :  { %v477_v28 = vadd.f32 %v1048_v56, %v476_v27  ;;  %v512_v31 = vmax.f32 %v474_v24, 0.0 }
 0x270   :  { %v515_v30 = vmax.f32 %v485_v26, 0.0 }
 0x271   :  { %v513_v32 = vmax.f32 %v477_v28, 0.0 }
 0x272   :  { %v525_v33 = vpack.c.bf16 %v515_v30, %v514_v29 }
 0x273   :  { %v524_v34 = vpack.c.bf16 %v513_v32, %v512_v31  ;;  %v1192_v35 = vpop.f32.mrb[12].mxu1 }
 0x274   :  { %v498_v36 = vadd.f32 %v1192_v35, %v1048_v56  ;;  %v489_v37 = vpop.f32.mrb[13].mxu1 }
 0x275   :  { %v490_v38 = vadd.f32 %v1048_v56, %v489_v37  ;;  %v1193_v39 = vpop.f32.mrb[14].mxu1  ;;  %1218 = vmatprep.mubr.bf16.mxu0 %v524_v34 }
 0x276   :  { %v501_v40 = vadd.f32 %v1193_v39, %v1048_v56  ;;  %v492_v41 = vpop.f32.mrb[15].mxu1  ;;  %1219 = vmatmul.mubr.bf16.gmra.mrb[24].mxu0 %v525_v33  ;;  %v518_v43 = vmax.f32 %v498_v36, 0.0 }
 0x277   :  { %v493_v42 = vadd.f32 %v1048_v56, %v492_v41  ;;  %v516_v45 = vmax.f32 %v490_v38, 0.0 }
 0x278   :  { %v519_v44 = vmax.f32 %v501_v40, 0.0 }
 0x279   :  { %v517_v46 = vmax.f32 %v493_v42, 0.0 }
 0x27a   :  { %v527_v54 = vpack.c.bf16 %v519_v44, %v518_v43 }
 0x27b   :  { %v526_v55 = vpack.c.bf16 %v517_v46, %v516_v45 }
 0x27d   :  { %1222 = vmatprep.mubr.bf16.mxu0 %v526_v55 }
 0x27e   :  { %1223 = vmatmul.mubr.bf16.gmra.mrb[28].mxu0 %v527_v54 }
 0x339   :  { %v1212_v57 = vpop.f32.mrb[16].mxu0 }
 0x33a   :  { %v626_v58 = vpop.f32.mrb[17].mxu0 }
 0x33b   :  { %v1213_v59 = vpop.f32.mrb[18].mxu0 }
 0x33c   :  { %v690_v60 = vpack.c.bf16 %v1213_v59, %v1212_v57  ;;  %v629_v61 = vpop.f32.mrb[19].mxu0 }
 0x33d   :  { %v689_v62 = vpack.c.bf16 %v629_v61, %v626_v58 }
 0x33f   :  { %1226 = vmatprep.subr.bf16.mxu1 %v689_v62 }
 0x340   :  { %1227 = vmatpush3.bf16.msra.mxu1 %v689_v62 }
 0x341   :  { %v1216_v63 = vpop.f32.mrb[20].mxu0  ;;  %1228 = vmatprep.subr.bf16.mxu1 %v690_v60 }
 0x342   :  { %v642_v0 = vpop.f32.mrb[21].mxu0 }
 0x343   :  { %v1217_v56 = vpop.f32.mrb[22].mxu0 }
 0x344   :  { %v692_v1 = vpack.c.bf16 %v1217_v56, %v1216_v63  ;;  %v645_v2 = vpop.f32.mrb[23].mxu0  ;;  %1229 = vmatpush3.bf16.msra.mxu1 %v690_v60 }
 0x345   :  { %v691_v3 = vpack.c.bf16 %v645_v2, %v642_v0 }
 0x347   :  { %1230 = vmatprep.subr.bf16.mxu1 %v691_v3 }
 0x348   :  { %1231 = vmatpush3.bf16.msra.mxu1 %v691_v3 }
 0x349   :  { %v1220_v4 = vpop.f32.mrb[24].mxu0  ;;  %1232 = vmatprep.subr.bf16.mxu1 %v692_v1 }
 0x34a   :  { %v658_v5 = vpop.f32.mrb[25].mxu0 }
 0x34b   :  { %v1221_v6 = vpop.f32.mrb[26].mxu0 }
 0x34c   :  { %v694_v7 = vpack.c.bf16 %v1221_v6, %v1220_v4  ;;  %v661_v8 = vpop.f32.mrb[27].mxu0  ;;  %1233 = vmatpush3.bf16.msra.mxu1 %v692_v1 }
 0x34d   :  { %v693_v9 = vpack.c.bf16 %v661_v8, %v658_v5 }
 0x34f   :  { %1234 = vmatprep.subr.bf16.mxu1 %v693_v9 }
 0x350   :  { %1235 = vmatpush3.bf16.msra.mxu1 %v693_v9 }
 0x351   :  { %v1224_v10 = vpop.f32.mrb[28].mxu0  ;;  %1236 = vmatprep.subr.bf16.mxu1 %v694_v7 }
 0x352   :  { %v674_v11 = vpop.f32.mrb[29].mxu0 }
 0x353   :  { %v1225_v12 = vpop.f32.mrb[30].mxu0 }
 0x354   :  { %v696_v13 = vpack.c.bf16 %v1225_v12, %v1224_v10  ;;  %v677_v14 = vpop.f32.mrb[31].mxu0  ;;  %1237 = vmatpush3.bf16.msra.mxu1 %v694_v7 }
 0x355   :  { %v695_v15 = vpack.c.bf16 %v677_v14, %v674_v11 }
 0x357   :  { %1238 = vmatprep.subr.bf16.mxu1 %v695_v15 }
 0x358   :  { %1239 = vmatpush3.bf16.msra.mxu1 %v695_v15 }
 0x359   :  { %1240 = vmatprep.subr.bf16.mxu1 %v696_v13 }
 0x35c   :  { %1241 = vmatpush3.bf16.msra.mxu1 %v696_v13 }
 0x35f   :  { %1243 = vmatmul.mubr.bf16.vlgmr.msra.gmra.mrb[16].mxu1 %v1677_v47 }
 0x360   :  { %1246 = vmatprep.mubr.bf16.mxu1 %v1679_v48 }
 0x367   :  { %1247 = vmatmul.mubr.bf16.gmra.mrb[20].mxu1 %v1683_v49 }
 0x368   :  { %1250 = vmatprep.mubr.bf16.mxu1 %v1685_v50 }
 0x36f   :  { %1251 = vmatmul.mubr.bf16.gmra.mrb[24].mxu1 %v1689_v51 }
 0x370   :  { %1254 = vmatprep.mubr.bf16.mxu1 %v1691_v52 }
 0x377   :  { %1255 = vmatmul.mubr.bf16.gmra.mrb[28].mxu1 %v1695_v53 }
 0x432   :  { %v1244_v19 = vpop.f32.mrb[16].mxu1 }
 0x433   :  { %v747_v47 = vadd.f32 %v1244_v19, %v1065_v18  ;;  %v738_v20 = vpop.f32.mrb[17].mxu1 }
 0x434   :  { %v739_v48 = vadd.f32 %v1065_v18, %v738_v20  ;;  %v1245_v21 = vpop.f32.mrb[18].mxu1 }
 0x435   :  { %v750_v49 = vadd.f32 %v1245_v21, %v1065_v18  ;;  %v741_v22 = vpop.f32.mrb[19].mxu1  ;;  %v806_v50 = vsel %vm803_vm0, %v747_v47, -1e+30 }
 0x436   :  { %v742_v51 = vadd.f32 %v1065_v18, %v741_v22  ;;  %824 = vmax.xlane.f32.xlu1 %v806_v50  ;;  %v804_v52 = vsel %vm803_vm0, %v739_v48, -1e+30 }
 0x437   :  { %820 = vmax.xlane.f32.xlu0 %v804_v52  ;;  %v807_v53 = vsel %vm803_vm0, %v750_v49, -1e+30 }
 0x438   :  { %v805_v24 = vsel %vm803_vm0, %v742_v51, -1e+30 }
 0x43a   :  { %826 = vmax.xlane.f32.xlu1 %v807_v53  ;;  %v1248_v23 = vpop.f32.mrb[20].mxu1 }
 0x43b   :  { %v763_v25 = vadd.f32 %v1248_v23, %v1065_v18  ;;  %v754_v26 = vpop.f32.mrb[21].mxu1  ;;  %822 = vmax.xlane.f32.xlu0 %v805_v24 }
 0x43c   :  { %v1249_v27 = vpop.f32.mrb[22].mxu1  ;;  %v755_v31 = vadd.f32 %v1065_v18, %v754_v26 }
 0x43d   :  { %v766_v28 = vadd.f32 %v1249_v27, %v1065_v18  ;;  %v757_v29 = vpop.f32.mrb[23].mxu1  ;;  %v810_v30 = vsel %vm803_vm0, %v763_v25, -1e+30 }
 0x43e   :  { %v758_v32 = vadd.f32 %v1065_v18, %v757_v29  ;;  %v808_v35 = vsel %vm803_vm0, %v755_v31, -1e+30 }
 0x43f   :  { %832 = vmax.xlane.f32.xlu0 %v810_v30  ;;  %v811_v33 = vsel %vm803_vm0, %v766_v28, -1e+30 }
 0x440   :  { %834 = vmax.xlane.f32.xlu1 %v811_v33  ;;  %v809_v38 = vsel %vm803_vm0, %v758_v32, -1e+30 }
 0x442   :  { %v1252_v34 = vpop.f32.mrb[24].mxu1 }
 0x443   :  { %v779_v36 = vadd.f32 %v1252_v34, %v1065_v18  ;;  %v770_v37 = vpop.f32.mrb[25].mxu1  ;;  %828 = vmax.xlane.f32.xlu0 %v808_v35 }
 0x444   :  { %v1253_v39 = vpop.f32.mrb[26].mxu1  ;;  %830 = vmax.xlane.f32.xlu1 %v809_v38  ;;  %v771_v43 = vadd.f32 %v1065_v18, %v770_v37 }
 0x445   :  { %v782_v40 = vadd.f32 %v1253_v39, %v1065_v18  ;;  %v773_v41 = vpop.f32.mrb[27].mxu1  ;;  %v814_v42 = vsel %vm803_vm0, %v779_v36, -1e+30 }
 0x446   :  { %v774_v44 = vadd.f32 %v1065_v18, %v773_v41  ;;  %v1731_v54 = vsel %vm803_vm0, %v771_v43, -1e+30 }
 0x447   :  { %840 = vmax.xlane.f32.xlu0 %v814_v42  ;;  %v815_v45 = vsel %vm803_vm0, %v782_v40, -1e+30 }
 0x448   :  { %842 = vmax.xlane.f32.xlu1 %v815_v45  ;;  %v1736_v57 = vsel %vm803_vm0, %v774_v44, -1e+30 }
 0x44a   :  { %v1256_v46 = vpop.f32.mrb[28].mxu1 }
 0x44b   :  { %v786_v55 = vpop.f32.mrb[29].mxu1  ;;  %836 = vmax.xlane.f32.xlu0 %v1731_v54  ;;  %v795_v61 = vadd.f32 %v1256_v46, %v1065_v18 }
 0x44c   :  { %v787_v58 = vadd.f32 %v1065_v18, %v786_v55  ;;  %v1257_v59 = vpop.f32.mrb[30].mxu1  ;;  %838 = vmax.xlane.f32.xlu1 %v1736_v57 }
 0x44d   :  { %v789_v60 = vpop.f32.mrb[31].mxu1  ;;  %v798_v0 = vadd.f32 %v1257_v59, %v1065_v18  ;;  %v1751_v1 = vsel %vm803_vm0, %v795_v61, -1e+30 }
 0x44e   :  { %v790_v62 = vadd.f32 %v1065_v18, %v789_v60  ;;  %v1741_v63 = vsel %vm803_vm0, %v787_v58, -1e+30 }
 0x44f   :  { %844 = vmax.xlane.f32.xlu0 %v1741_v63  ;;  %v1756_v2 = vsel %vm803_vm0, %v798_v0, -1e+30 }
 0x450   :  { %v1746_v56 = vsel %vm803_vm0, %v790_v62, -1e+30 }
 0x451   :  { %846 = vmax.xlane.f32.xlu1 %v1746_v56 }
 0x453   :  { %848 = vmax.xlane.f32.xlu0 %v1751_v1 }
 0x455   :  { %850 = vmax.xlane.f32.xlu1 %v1756_v2 }
 0x4c3   :  { %v825_v3 = vpop.xlane.xlu1 %824 }
 0x4c4   :  { %v1759_v4 = vsub.f32 %v806_v50, %v825_v3  ;;  %v821_v5 = vpop.xlane.xlu0 %820 }
 0x4c5   :  { %v1761_v6 = vsub.f32 %v804_v52, %v821_v5 }
 0x4c6   :  { %v872_v7 = vmul.f32 1.442695, %v1759_v4 }
 0x4c7   :  { %v868_v8 = vmul.f32 1.442695, %v1761_v6  ;;  %v827_v9 = vpop.xlane.xlu1 %826 }
 0x4c8   :  { %1301 = vpow2.f32 %v872_v7  ;;  %v1765_v10 = vsub.f32 %v807_v53, %v827_v9  ;;  %v823_v11 = vpop.xlane.xlu0 %822 }
 0x4c9   :  { %v1767_v12 = vsub.f32 %v805_v24, %v823_v11  ;;  %1303 = vpow2.f32 %v868_v8 }
 0x4ca   :  { %v874_v13 = vmul.f32 1.442695, %v1765_v10 }
 0x4cb   :  { %v870_v14 = vmul.f32 1.442695, %v1767_v12 }
 0x4cc   :  { %1305 = vpow2.f32 %v874_v13  ;;  %v833_v15 = vpop.xlane.xlu0 %832 }
 0x4cd   :  { %v1771_v16 = vsub.f32 %v810_v30, %v833_v15  ;;  %v835_v18 = vpop.xlane.xlu1 %834  ;;  %1307 = vpow2.f32 %v870_v14 }
 0x4ce   :  { %v1773_v19 = vsub.f32 %v811_v33, %v835_v18 }
 0x4cf   :  { %v880_v47 = vmul.f32 1.442695, %v1771_v16 }
 0x4d0   :  { %v882_v20 = vmul.f32 1.442695, %v1773_v19  ;;  %v829_v48 = vpop.xlane.xlu0 %828 }
 0x4d1   :  { %1309 = vpow2.f32 %v880_v47  ;;  %v1777_v21 = vsub.f32 %v808_v35, %v829_v48  ;;  %v831_v49 = vpop.xlane.xlu1 %830 }
 0x4d2   :  { %v1302_v22 = vpop.eup %1301  ;;  %v1779_v50 = vsub.f32 %v809_v38, %v831_v49  ;;  %1311 = vpow2.f32 %v882_v20 }
 0x4d3   :  { %v876_v51 = vmul.f32 1.442695, %v1777_v21  ;;  %904 = vadd.xlane.f32.xlu0 %v1302_v22  ;;  %v1304_v23 = vpop.eup %1303 }
 0x4d4   :  { %v878_v52 = vmul.f32 1.442695, %v1779_v50  ;;  %v841_v53 = vpop.xlane.xlu0 %840 }
 0x4d5   :  { %1313 = vpow2.f32 %v876_v51  ;;  %v1783_v24 = vsub.f32 %v814_v42, %v841_v53  ;;  %v843_v25 = vpop.xlane.xlu1 %842 }
 0x4d6   :  { %v1306_v26 = vpop.eup %1305  ;;  %v1785_v27 = vsub.f32 %v815_v45, %v843_v25  ;;  %1315 = vpow2.f32 %v878_v52 }
 0x4d7   :  { %v888_v28 = vmul.f32 1.442695, %v1783_v24  ;;  %906 = vadd.xlane.f32.xlu1 %v1306_v26  ;;  %900 = vadd.xlane.f32.xlu0 %v1304_v23  ;;  %v1308_v33 = vpop.eup %1307 }
 0x4d8   :  { %v890_v29 = vmul.f32 1.442695, %v1785_v27  ;;  %v837_v30 = vpop.xlane.xlu0 %836 }
 0x4d9   :  { %1317 = vpow2.f32 %v888_v28  ;;  %v1790_v31 = vsub.f32 %v1731_v54, %v837_v30  ;;  %v839_v32 = vpop.xlane.xlu1 %838 }
 0x4da   :  { %v1793_v34 = vsub.f32 %v1736_v57, %v839_v32  ;;  %1319 = vpow2.f32 %v890_v29 }
 0x4db   :  { %v1310_v35 = vpop.eup %1309  ;;  %v884_v36 = vmul.f32 1.442695, %v1790_v31  ;;  %902 = vadd.xlane.f32.xlu1 %v1308_v33 }
 0x4dc   :  { %v886_v37 = vmul.f32 1.442695, %v1793_v34  ;;  %912 = vadd.xlane.f32.xlu0 %v1310_v35  ;;  %v845_v38 = vpop.xlane.xlu0 %844  ;;  %v1312_v40 = vpop.eup %1311 }
 0x4dd   :  { %1321 = vpow2.f32 %v884_v36  ;;  %v1798_v39 = vsub.f32 %v1741_v63, %v845_v38 }
 0x4de   :  { %v847_v41 = vpop.xlane.xlu1 %846  ;;  %1323 = vpow2.f32 %v886_v37 }
 0x4df   :  { %v1314_v42 = vpop.eup %1313  ;;  %v892_v43 = vmul.f32 1.442695, %v1798_v39  ;;  %v1802_v44 = vsub.f32 %v1746_v56, %v847_v41  ;;  %914 = vadd.xlane.f32.xlu1 %v1312_v40 }
 0x4e0   :  { %908 = vadd.xlane.f32.xlu0 %v1314_v42  ;;  %v849_v45 = vpop.xlane.xlu0 %848  ;;  %v1316_v55 = vpop.eup %1315 }
 0x4e1   :  { %1325 = vpow2.f32 %v892_v43  ;;  %v894_v46 = vmul.f32 1.442695, %v1802_v44  ;;  %v1806_v54 = vsub.f32 %v1751_v1, %v849_v45 }
 0x4e2   :  { %v851_v57 = vpop.xlane.xlu1 %850 }
 0x4e3   :  { %v1318_v58 = vpop.eup %1317  ;;  %1327 = vpow2.f32 %v894_v46  ;;  %v896_v59 = vmul.f32 1.442695, %v1806_v54  ;;  %v1810_v60 = vsub.f32 %v1756_v2, %v851_v57  ;;  %910 = vadd.xlane.f32.xlu1 %v1316_v55 }
 0x4e4   :  { %920 = vadd.xlane.f32.xlu0 %v1318_v58  ;;  %v1320_v62 = vpop.eup %1319 }
 0x4e5   :  { %1329 = vpow2.f32 %v896_v59  ;;  %v898_v61 = vmul.f32 1.442695, %v1810_v60 }
 0x4e7   :  { %v1322_v63 = vpop.eup %1321  ;;  %1331 = vpow2.f32 %v898_v61  ;;  %922 = vadd.xlane.f32.xlu1 %v1320_v62 }
 0x4e8   :  { %916 = vadd.xlane.f32.xlu0 %v1322_v63  ;;  %v1324_v0 = vpop.eup %1323 }
 0x4eb   :  { %v1326_v56 = vpop.eup %1325  ;;  %918 = vadd.xlane.f32.xlu1 %v1324_v0 }
 0x4ec   :  { %924 = vadd.xlane.f32.xlu0 %v1326_v56 }
 0x4ed   :  { %v1328_v1 = vpop.eup %1327 }
 0x4ef   :  { %v1330_v3 = vpop.eup %1329  ;;  %926 = vadd.xlane.f32.xlu1 %v1328_v1 }
 0x4f0   :  { %928 = vadd.xlane.f32.xlu0 %v1330_v3 }
 0x4f1   :  { %v1332_v2 = vpop.eup %1331 }
 0x4f3   :  { %930 = vadd.xlane.f32.xlu1 %v1332_v2 }
 0x560   :  { %v905_v5 = vpop.xlane.xlu0 %904 }
 0x561   :  { %1333 = vlog2.f32 %v905_v5 }
 0x564   :  { %v907_v7 = vpop.xlane.xlu1 %906  ;;  %v901_v8 = vpop.xlane.xlu0 %900 }
 0x565   :  { %1335 = vlog2.f32 %v907_v7 }
 0x566   :  { %1337 = vlog2.f32 %v901_v8 }
 0x568   :  { %v903_v9 = vpop.xlane.xlu1 %902 }
 0x569   :  { %1339 = vlog2.f32 %v903_v9  ;;  %v913_v11 = vpop.xlane.xlu0 %912 }
 0x56a   :  { %1341 = vlog2.f32 %v913_v11 }
 0x56b   :  { %v1334_v13 = vpop.eup %1333 }
 0x56c   :  { %v937_v14 = vmul.f32 0.6931472, %v1334_v13  ;;  %v915_v15 = vpop.xlane.xlu1 %914 }
 0x56d   :  { %1343 = vlog2.f32 %v915_v15  ;;  %v909_v18 = vpop.xlane.xlu0 %908 }
 0x56e   :  { %v966_v47 = vsub.f32 %v1759_v4, %v937_v14  ;;  %1345 = vlog2.f32 %v909_v18 }
 0x56f   :  { %v1336_v20 = vpop.eup %1335 }
 0x570   :  { %v1338_v48 = vpop.eup %1337  ;;  %v982_v49 = vsel %vm803_vm0, %v966_v47, 0.0  ;;  %v939_v22 = vmul.f32 0.6931472, %v1336_v20  ;;  %v911_v51 = vpop.xlane.xlu1 %910 }
 0x571   :  { %998 = vst [vmem:[#allocation13 + $0x10] sm:$0xff] %v982_v49  ;;  %v933_v52 = vmul.f32 0.6931472, %v1338_v48  ;;  %1347 = vlog2.f32 %v911_v51  ;;  %v921_v53 = vpop.xlane.xlu0 %920 }
 0x572   :  { %v967_v23 = vsub.f32 %v1765_v10, %v939_v22  ;;  %1349 = vlog2.f32 %v921_v53 }
 0x573   :  { %v1340_v25 = vpop.eup %1339  ;;  %v964_v26 = vsub.f32 %v1761_v6, %v933_v52 }
 0x574   :  { %v1342_v28 = vpop.eup %1341  ;;  %v983_v4 = vsel %vm803_vm0, %v967_v23, 0.0  ;;  %v935_v29 = vmul.f32 0.6931472, %v1340_v25  ;;  %v923_v30 = vpop.xlane.xlu1 %922 }
 0x575   :  { %999 = vst [vmem:[#allocation13 + $0x18] sm:$0xff] %v983_v4  ;;  %v980_v32 = vsel %vm803_vm0, %v964_v26, 0.0  ;;  %v945_v33 = vmul.f32 0.6931472, %v1342_v28  ;;  %1351 = vlog2.f32 %v923_v30  ;;  %v917_v35 = vpop.xlane.xlu0 %916 }
 0x576   :  { %996 = vst [vmem:[#allocation13] sm:$0xff] %v980_v32  ;;  %v965_v10 = vsub.f32 %v1767_v12, %v935_v29  ;;  %1353 = vlog2.f32 %v917_v35 }
 0x577   :  { %v1344_v36 = vpop.eup %1343  ;;  %v970_v6 = vsub.f32 %v1771_v16, %v945_v33 }
 0x578   :  { %v1346_v37 = vpop.eup %1345  ;;  %v981_v38 = vsel %vm803_vm0, %v965_v10, 0.0  ;;  %v947_v40 = vmul.f32 0.6931472, %v1344_v36  ;;  %v919_v41 = vpop.xlane.xlu1 %918 }
 0x579   :  { %997 = vst [vmem:[#allocation13 + $0x8] sm:$0xff] %v981_v38  ;;  %v986_v42 = vsel %vm803_vm0, %v970_v6, 0.0  ;;  %v941_v43 = vmul.f32 0.6931472, %v1346_v37  ;;  %1355 = vlog2.f32 %v919_v41  ;;  %v925_v45 = vpop.xlane.xlu0 %924 }
 0x57a   :  { %1002 = vst [vmem:[#allocation13 + $0x30] sm:$0xff] %v986_v42  ;;  %v971_v12 = vsub.f32 %v1773_v19, %v947_v40  ;;  %1357 = vlog2.f32 %v925_v45 }
 0x57b   :  { %v1348_v46 = vpop.eup %1347  ;;  %v968_v16 = vsub.f32 %v1777_v21, %v941_v43 }
 0x57c   :  { %v1350_v55 = vpop.eup %1349  ;;  %v987_v57 = vsel %vm803_vm0, %v971_v12, 0.0  ;;  %v943_v58 = vmul.f32 0.6931472, %v1348_v46  ;;  %v927_v59 = vpop.xlane.xlu1 %926 }
 0x57d   :  { %1003 = vst [vmem:[#allocation13 + $0x38] sm:$0xff] %v987_v57  ;;  %v984_v61 = vsel %vm803_vm0, %v968_v16, 0.0  ;;  %v953_v62 = vmul.f32 0.6931472, %v1350_v55  ;;  %1359 = vlog2.f32 %v927_v59  ;;  %v929_v63 = vpop.xlane.xlu0 %928 }
 0x57e   :  { %1000 = vst [vmem:[#allocation13 + $0x20] sm:$0xff] %v984_v61  ;;  %v969_v19 = vsub.f32 %v1779_v50, %v943_v58  ;;  %1361 = vlog2.f32 %v929_v63 }
 0x57f   :  { %v1352_v0 = vpop.eup %1351  ;;  %v974_v21 = vsub.f32 %v1783_v24, %v953_v62 }
 0x580   :  { %v1354_v56 = vpop.eup %1353  ;;  %v985_v1 = vsel %vm803_vm0, %v969_v19, 0.0  ;;  %v955_v3 = vmul.f32 0.6931472, %v1352_v0  ;;  %v931_v2 = vpop.xlane.xlu1 %930 }
 0x581   :  { %1001 = vst [vmem:[#allocation13 + $0x28] sm:$0xff] %v985_v1  ;;  %v990_v5 = vsel %vm803_vm0, %v974_v21, 0.0  ;;  %v949_v7 = vmul.f32 0.6931472, %v1354_v56  ;;  %1363 = vlog2.f32 %v931_v2 }
 0x582   :  { %1006 = vst [vmem:[#allocation13 + $0x50] sm:$0xff] %v990_v5  ;;  %v975_v8 = vsub.f32 %v1785_v27, %v955_v3 }
 0x583   :  { %v1356_v50 = vpop.eup %1355  ;;  %v972_v9 = vsub.f32 %v1790_v31, %v949_v7 }
 0x584   :  { %v1358_v11 = vpop.eup %1357  ;;  %v991_v24 = vsel %vm803_vm0, %v975_v8, 0.0  ;;  %v951_v13 = vmul.f32 0.6931472, %v1356_v50 }
 0x585   :  { %1007 = vst [vmem:[#allocation13 + $0x58] sm:$0xff] %v991_v24  ;;  %v988_v14 = vsel %vm803_vm0, %v972_v9, 0.0  ;;  %v957_v15 = vmul.f32 0.6931472, %v1358_v11 }
 0x586   :  { %1004 = vst [vmem:[#allocation13 + $0x40] sm:$0xff] %v988_v14  ;;  %v973_v18 = vsub.f32 %v1793_v34, %v951_v13 }
 0x587   :  { %v1360_v47 = vpop.eup %1359  ;;  %v976_v20 = vsub.f32 %v1798_v39, %v957_v15 }
 0x588   :  { %v1362_v27 = vpop.eup %1361  ;;  %v989_v31 = vsel %vm803_vm0, %v973_v18, 0.0  ;;  %v959_v48 = vmul.f32 0.6931472, %v1360_v47 }
 0x589   :  { %1005 = vst [vmem:[#allocation13 + $0x48] sm:$0xff] %v989_v31  ;;  %v992_v49 = vsel %vm803_vm0, %v976_v20, 0.0  ;;  %v961_v22 = vmul.f32 0.6931472, %v1362_v27 }
 0x58a   :  { %1008 = vst [vmem:[#allocation13 + $0x60] sm:$0xff] %v992_v49  ;;  %v977_v51 = vsub.f32 %v1802_v44, %v959_v48 }
 0x58b   :  { %v1364_v52 = vpop.eup %1363  ;;  %v978_v53 = vsub.f32 %v1806_v54, %v961_v22 }
 0x58c   :  { %v993_v34 = vsel %vm803_vm0, %v977_v51, 0.0  ;;  %v963_v39 = vmul.f32 0.6931472, %v1364_v52 }
 0x58d   :  { %1009 = vst [vmem:[#allocation13 + $0x68] sm:$0xff] %v993_v34  ;;  %v994_v23 = vsel %vm803_vm0, %v978_v53, 0.0 }
 0x58e   :  { %1010 = vst [vmem:[#allocation13 + $0x70] sm:$0xff] %v994_v23  ;;  %v979_v25 = vsub.f32 %v1810_v60, %v963_v39 }
 0x590   :  { %v995_v44 = vsel %vm803_vm0, %v979_v25, 0.0 }
 0x591   :  { %1011 = vst [vmem:[#allocation13 + $0x78] sm:$0xff] %v995_v44 }
 0x592   :  { %1508 = shalt.err (!%p1505_p10)
}
 0x593   :  { %s1509_s22 = scalar_lea.hbm %s1879_s6, 2048 }
 0x594   :  { %p1510_p11 = scmp.ne.s32.totalorder %s1879_s6, %s1509_s22  ;;  %p1513_p12 = scmp.lt.u32.totalorder %s1509_s22, %s1879_s6 }
 0x596   :  { %p1515_p13 = pnand %p1513_p12, %p1510_p11 }
 0x598   :  { %1518 = shalt.err (!%p1515_p13)
}
 0x599   :  { %s1538_s29 = smov 128   ;;  %s1539_s30 = smov 8  }
 0x59a   :  { %1023 = dma.vmem_to_hbm [thread:$0]  %s1018_s10, 2048, %s1879_s6, [#allocation4], %s1538_s29, %s1538_s29, %s1539_s30  }
 0x59b   :  { %1527 = dma.done.wait [#allocation4], 2048  }
 0x59c   :  { %1528 = vsyncadd [#allocation4], 4294965248 }
 0x59d   :  { %1027 = vsyncpa [#allocation3], 1 }
 0x59e   :  { %1028 = vsyncpa [#allocation6], 1 }
 0x59f   :  { %1029 = vsyncpa [#allocation9], 1 }
 0x5a0   :  { %1030 = vsyncpa [#allocation12], 1 }
 0x5a1   :  { %1031 = vsyncpa [#allocation4], 1 }

</bundles_post_ra>
